<compile_context>
chip_gen: v6e
topology: v6e:2x2x1
jax: 0.10.0
libtpu: 0.0.40
codegen_flags: <defaults>
</compile_context>

<pallas_src>
import functools

import jax
import jax.numpy as jnp
from jax import lax
from jax.experimental import pallas as pl
from jax.experimental.pallas import tpu as pltpu

LANE = 128  # pad hidden width to the 128-lane vreg width


def _round_up(n, m):
    return ((n + m - 1) // m) * m


def _fused_mlp_kernel(*refs, num_hidden):
    """Whole MLP forward for one (tm, K) batch tile, entirely in VMEM/vregs."""
    if num_hidden > 0:
        x_ref, w1_ref, b1_ref, wh_ref, bh_ref, wp_ref, bp_ref, o_ref = refs
    else:
        x_ref, w1_ref, b1_ref, wp_ref, bp_ref, o_ref = refs
        wh_ref = bh_ref = None

    # first_layer + ReLU: bf16 operands on the MXU, f32 accumulate/elementwise.
    h = jnp.dot(x_ref[...].astype(jnp.bfloat16), w1_ref[...],
                preferred_element_type=jnp.float32)
    h = jnp.maximum(h + b1_ref[...], 0.0)

    # hidden layers + ReLU; stacked bf16 weights (L, Hp, Hp) are VMEM-resident.
    if num_hidden > 0:
        if num_hidden <= 8:
            for l in range(num_hidden):          # small L: full unroll
                h = jnp.dot(h.astype(jnp.bfloat16), wh_ref[l],
                            preferred_element_type=jnp.float32)
                h = jnp.maximum(h + bh_ref[l], 0.0)
        else:
            def body(l, h):                      # large L: bound live ranges
                hh = jnp.dot(h.astype(jnp.bfloat16), wh_ref[l],
                             preferred_element_type=jnp.float32)
                return jnp.maximum(hh + bh_ref[l], 0.0)
            h = lax.fori_loop(0, num_hidden, body, h)

    # predict (out_dim == 1): VPU broadcast-multiply + cross-lane reduce, then
    # stored lane-dense as a (1, 1, tm) row (one cheap relayout of y) instead
    # of a masked (tm, 1) column store.
    y = jnp.sum(h * wp_ref[...], axis=-1)[None, :] + bp_ref[...]
    o_ref[...] = y.reshape(o_ref.shape).astype(o_ref.dtype)


def _pick_tm(M):
    """<=256 rows per tile; aim for >=2 grid steps so v7x's 2 TCs both work."""
    if M <= 256:
        half = _round_up(pl.cdiv(M, 2), 8)
        return half if half < M else M
    return 256


def fused_mlp(x, packed, *, num_hidden, tm=None):
    """y = predict(relu(hidden_L(...relu(first(x))...))) in one pallas_call."""
    w1, b1, wh, bh, wp, bp = packed
    M, K = x.shape
    assert w1.shape[0] == K
    Hp = w1.shape[1]
    if tm is None:
        tm = _pick_tm(M)
    num_tiles = pl.cdiv(M, tm)
    grid = (num_tiles,)

    args = [x, w1, b1]
    in_specs = [
        pl.BlockSpec((tm, K), lambda i: (i, 0)),      # x: tiled over batch
        pl.BlockSpec(w1.shape, lambda i: (0, 0)),     # weights: VMEM-resident
        pl.BlockSpec(b1.shape, lambda i: (0, 0)),
    ]
    if num_hidden > 0:
        args += [wh, bh]
        in_specs += [
            pl.BlockSpec(wh.shape, lambda i: (0, 0, 0)),
            pl.BlockSpec(bh.shape, lambda i: (0, 0, 0)),
        ]
    args += [wp, bp]
    in_specs += [
        pl.BlockSpec(wp.shape, lambda i: (0, 0)),
        pl.BlockSpec(bp.shape, lambda i: (0, 0)),
    ]

    # Advisory cost hint for XLA's scheduler.
    flops = 2 * M * Hp * (K + num_hidden * Hp + 1)
    bytes_accessed = (x.size * x.dtype.itemsize
                      + sum(a.size * a.dtype.itemsize for a in args[1:])
                      + num_tiles * tm * jnp.dtype(x.dtype).itemsize)
    cost = pl.CostEstimate(flops=int(flops), transcendentals=0,
                           bytes_accessed=int(bytes_accessed))

    kernel = functools.partial(_fused_mlp_kernel, num_hidden=num_hidden)
    out = pl.pallas_call(
        kernel,
        out_shape=jax.ShapeDtypeStruct((num_tiles, 1, tm), x.dtype),
        grid=grid,
        in_specs=in_specs,
        out_specs=pl.BlockSpec((1, 1, tm), lambda i: (i, 0, 0)),  # lane-dense
        compiler_params=pltpu.CompilerParams(
            dimension_semantics=("parallel",),
            vmem_limit_bytes=32 * 1024 * 1024),
        cost_estimate=cost,
    )(*args)

    # (num_tiles, 1, tm) slab -> (M, 1); padded tail rows (garbage) sliced off.
    return out.reshape(-1)[:M].reshape(M, 1)


def init_net_params(key, feature_dim, hidden_dim, hidden_layer_num,
                    dtype=jnp.float32):
    """nn.Linear-style uniform(-1/sqrt(in), 1/sqrt(in)); weights as (in, out)."""
    def make_linear(k, in_dim, out_dim):
        kw, kb = jax.random.split(k)
        bound = 1.0 / jnp.sqrt(jnp.asarray(in_dim, dtype))
        w = jax.random.uniform(kw, (in_dim, out_dim), dtype, -bound, bound)
        b = jax.random.uniform(kb, (1, out_dim), dtype, -bound, bound)
        return w, b

    keys = jax.random.split(key, hidden_layer_num + 2)
    params = [make_linear(keys[0], feature_dim, hidden_dim)]          # first_layer
    for i in range(hidden_layer_num):                                 # hidden layers
        params.append(make_linear(keys[1 + i], hidden_dim, hidden_dim))
    params.append(make_linear(keys[-1], hidden_dim, 1))               # predict
    return params


def pack_params(params, feature_dim, hidden_dim, hidden_layer_num,
                compute_dtype=jnp.bfloat16, param_dtype=jnp.float32):
    """Zero-pad hidden width to 128 lanes, stack hidden layers, bf16 matmul weights."""
    Hp = _round_up(hidden_dim, LANE)
    (w1, b1), hidden, (wp, bp) = params[0], params[1:-1], params[-1]

    w1p = (jnp.zeros((feature_dim, Hp), param_dtype)
           .at[:, :hidden_dim].set(w1).astype(compute_dtype))
    b1p = jnp.zeros((1, Hp), param_dtype).at[:, :hidden_dim].set(b1)

    if hidden_layer_num > 0:
        whp = jnp.zeros((hidden_layer_num, Hp, Hp), param_dtype)
        bhp = jnp.zeros((hidden_layer_num, 1, Hp), param_dtype)
        for l, (w, b) in enumerate(hidden):
            whp = whp.at[l, :hidden_dim, :hidden_dim].set(w)
            bhp = bhp.at[l, :, :hidden_dim].set(b)
        whp = whp.astype(compute_dtype)
    else:
        whp = None   # no dummy zero stack: never allocated / DMA'd
        bhp = None

    # predict weight stored as a (1, Hp) f32 row so the last layer is a VPU reduce.
    wpp = jnp.zeros((1, Hp), param_dtype).at[:, :hidden_dim].set(wp[:, 0][None, :])
    bpp = jnp.asarray(bp, param_dtype).reshape(1, 1)
    return (w1p, b1p, whp, bhp, wpp, bpp)


@functools.partial(jax.jit, static_argnames=("num_hidden",))
def net_forward(x, packed, num_hidden):
    return fused_mlp(x, packed, num_hidden=num_hidden)


if __name__ == "__main__":
    feature_dim = 16
    hidden_dim = 32
    hidden_layer_num = 2
    batch = 8

    key = jax.random.PRNGKey(0)
    k_params, k_x = jax.random.split(key)

    params = init_net_params(k_params, feature_dim, hidden_dim, hidden_layer_num)
    packed = pack_params(params, feature_dim, hidden_dim, hidden_layer_num)
    x = jax.random.normal(k_x, (batch, feature_dim), jnp.float32)

    out = net_forward(x, packed, num_hidden=hidden_layer_num)
    jax.block_until_ready(out)
    assert out.shape == (batch, 1), out.shape

    # Pure-JAX f32 reference on the unpadded parameters (loose tolerance: the
    # kernel uses bf16 matmul operands with f32 accumulation).
    ref = x
    for i, (w, b) in enumerate(params):
        ref = ref @ w + b
        if i < len(params) - 1:
            ref = jnp.maximum(ref, 0.0)
    assert jnp.allclose(out, ref, atol=5e-2, rtol=5e-2), (out, ref)

    print("KERNEL_OK")
</pallas_src>

<mosaic_0001>
module attributes {stable_mosaic.version = 11 : i64} {
  func.func @_fused_mlp_kernel(%arg0: i32, %arg1: memref<8x16xf32, #tpu.memory_space<vmem>>, %arg2: memref<16x128xbf16, #tpu.memory_space<vmem>>, %arg3: memref<1x128xf32, #tpu.memory_space<vmem>>, %arg4: memref<2x128x128xbf16, #tpu.memory_space<vmem>>, %arg5: memref<2x1x128xf32, #tpu.memory_space<vmem>>, %arg6: memref<1x128xf32, #tpu.memory_space<vmem>>, %arg7: memref<1x1xf32, #tpu.memory_space<vmem>>, %arg8: memref<1x1x8xf32, #tpu.memory_space<vmem>>) attributes {dimension_semantics = [#tpu.dimension_semantics<parallel>], iteration_bounds = array<i64: 1>, scalar_prefetch = 0 : i64, scratch_operands = 0 : i64, tpu.core_type = #tpu.core_type<tc>, window_params = [{transform_indices = @transform_0, window_bounds = array<i64: 8, 16>}, {pipeline_mode = #tpu.pipeline_mode<synchronous>, transform_indices = @transform_1, window_bounds = array<i64: 16, 128>}, {pipeline_mode = #tpu.pipeline_mode<synchronous>, transform_indices = @transform_2, window_bounds = array<i64: 1, 128>}, {pipeline_mode = #tpu.pipeline_mode<synchronous>, transform_indices = @transform_3, window_bounds = array<i64: 2, 128, 128>}, {pipeline_mode = #tpu.pipeline_mode<synchronous>, transform_indices = @transform_4, window_bounds = array<i64: 2, 1, 128>}, {pipeline_mode = #tpu.pipeline_mode<synchronous>, transform_indices = @transform_5, window_bounds = array<i64: 1, 128>}, {pipeline_mode = #tpu.pipeline_mode<synchronous>, transform_indices = @transform_6, window_bounds = array<i64: 1, 1>}, {transform_indices = @transform_7, window_bounds = array<i64: 1, 1, 8>}]} {
    %c0 = arith.constant 0 : index
    %c0_0 = arith.constant 0 : index
    %0 = vector.load %arg1[%c0, %c0_0] : memref<8x16xf32, #tpu.memory_space<vmem>>, vector<8x16xf32>
    %1 = arith.truncf %0 : vector<8x16xf32> to vector<8x16xbf16>
    %c0_1 = arith.constant 0 : index
    %c0_2 = arith.constant 0 : index
    %2 = vector.load %arg2[%c0_1, %c0_2] : memref<16x128xbf16, #tpu.memory_space<vmem>>, vector<16x128xbf16>
    %cst = arith.constant dense<0.000000e+00> : vector<8x128xf32>
    %3 = tpu.matmul %1, %2, %cst {dimension_numbers = #tpu.dot_dimension_numbers<[1], [0], [0], [1], [0, 0, 1, 1], [], []>} : vector<8x16xbf16>, vector<16x128xbf16>, vector<8x128xf32> -> vector<8x128xf32>
    %c0_3 = arith.constant 0 : index
    %c0_4 = arith.constant 0 : index
    %4 = vector.load %arg3[%c0_3, %c0_4] : memref<1x128xf32, #tpu.memory_space<vmem>>, vector<1x128xf32>
    %5 = vector.broadcast %4 : vector<1x128xf32> to vector<8x128xf32>
    %6 = arith.addf %3, %5 : vector<8x128xf32>
    %cst_5 = arith.constant 0.000000e+00 : f32
    %7 = vector.broadcast %cst_5 : f32 to vector<8x128xf32>
    %8 = arith.maximumf %6, %7 : vector<8x128xf32>
    %9 = arith.truncf %8 : vector<8x128xf32> to vector<8x128xbf16>
    %c0_6 = arith.constant 0 : index
    %c0_7 = arith.constant 0 : index
    %c0_8 = arith.constant 0 : index
    %10 = vector.load %arg4[%c0_6, %c0_7, %c0_8] : memref<2x128x128xbf16, #tpu.memory_space<vmem>>, vector<1x128x128xbf16>
    %11 = vector.shape_cast %10 : vector<1x128x128xbf16> to vector<128x128xbf16>
    %cst_9 = arith.constant dense<0.000000e+00> : vector<8x128xf32>
    %12 = tpu.matmul %9, %11, %cst_9 {dimension_numbers = #tpu.dot_dimension_numbers<[1], [0], [0], [1], [0, 0, 1, 1], [], []>} : vector<8x128xbf16>, vector<128x128xbf16>, vector<8x128xf32> -> vector<8x128xf32>
    %c0_10 = arith.constant 0 : index
    %c0_11 = arith.constant 0 : index
    %c0_12 = arith.constant 0 : index
    %13 = vector.load %arg5[%c0_10, %c0_11, %c0_12] : memref<2x1x128xf32, #tpu.memory_space<vmem>>, vector<1x1x128xf32>
    %14 = vector.shape_cast %13 : vector<1x1x128xf32> to vector<1x128xf32>
    %15 = vector.broadcast %14 : vector<1x128xf32> to vector<8x128xf32>
    %16 = arith.addf %12, %15 : vector<8x128xf32>
    %cst_13 = arith.constant 0.000000e+00 : f32
    %17 = vector.broadcast %cst_13 : f32 to vector<8x128xf32>
    %18 = arith.maximumf %16, %17 : vector<8x128xf32>
    %19 = arith.truncf %18 : vector<8x128xf32> to vector<8x128xbf16>
    %c1 = arith.constant 1 : index
    %c0_14 = arith.constant 0 : index
    %c0_15 = arith.constant 0 : index
    %20 = vector.load %arg4[%c1, %c0_14, %c0_15] : memref<2x128x128xbf16, #tpu.memory_space<vmem>>, vector<1x128x128xbf16>
    %21 = vector.shape_cast %20 : vector<1x128x128xbf16> to vector<128x128xbf16>
    %cst_16 = arith.constant dense<0.000000e+00> : vector<8x128xf32>
    %22 = tpu.matmul %19, %21, %cst_16 {dimension_numbers = #tpu.dot_dimension_numbers<[1], [0], [0], [1], [0, 0, 1, 1], [], []>} : vector<8x128xbf16>, vector<128x128xbf16>, vector<8x128xf32> -> vector<8x128xf32>
    %c1_17 = arith.constant 1 : index
    %c0_18 = arith.constant 0 : index
    %c0_19 = arith.constant 0 : index
    %23 = vector.load %arg5[%c1_17, %c0_18, %c0_19] : memref<2x1x128xf32, #tpu.memory_space<vmem>>, vector<1x1x128xf32>
    %24 = vector.shape_cast %23 : vector<1x1x128xf32> to vector<1x128xf32>
    %25 = vector.broadcast %24 : vector<1x128xf32> to vector<8x128xf32>
    %26 = arith.addf %22, %25 : vector<8x128xf32>
    %cst_20 = arith.constant 0.000000e+00 : f32
    %27 = vector.broadcast %cst_20 : f32 to vector<8x128xf32>
    %28 = arith.maximumf %26, %27 : vector<8x128xf32>
    %c0_21 = arith.constant 0 : index
    %c0_22 = arith.constant 0 : index
    %29 = vector.load %arg6[%c0_21, %c0_22] : memref<1x128xf32, #tpu.memory_space<vmem>>, vector<1x128xf32>
    %30 = vector.broadcast %29 : vector<1x128xf32> to vector<8x128xf32>
    %31 = arith.mulf %28, %30 : vector<8x128xf32>
    %cst_23 = arith.constant dense<0.000000e+00> : vector<8xf32>
    %32 = vector.multi_reduction <add>, %31, %cst_23 [1] : vector<8x128xf32> to vector<8xf32>
    %33 = vector.shape_cast %32 : vector<8xf32> to vector<1x8xf32>
    %c0_24 = arith.constant 0 : index
    %c0_25 = arith.constant 0 : index
    %34 = vector.load %arg7[%c0_24, %c0_25] : memref<1x1xf32, #tpu.memory_space<vmem>>, vector<1x1xf32>
    %35 = vector.broadcast %34 : vector<1x1xf32> to vector<1x8xf32>
    %36 = arith.addf %33, %35 : vector<1x8xf32>
    %37 = vector.shape_cast %36 : vector<1x8xf32> to vector<1x1x8xf32>
    %c0_26 = arith.constant 0 : index
    %c0_27 = arith.constant 0 : index
    %c0_28 = arith.constant 0 : index
    %38 = vector.load %arg8[%c0_26, %c0_27, %c0_28] : memref<1x1x8xf32, #tpu.memory_space<vmem>>, vector<1x1x8xf32>
    tpu.vector_store %arg8[%c0_26, %c0_27, %c0_28], %37 {strides = array<i32>} : memref<1x1x8xf32, #tpu.memory_space<vmem>>, vector<1x1x8xf32>,
    return
  }
  func.func @transform_0(%arg0: i32) -> (i32, i32) {
    %c0_i32 = arith.constant 0 : i32
    %c0_i32_0 = arith.constant 0 : i32
    return %arg0, %c0_i32 : i32, i32
  }
  func.func @transform_1(%arg0: i32) -> (i32, i32) {
    %c0_i32 = arith.constant 0 : i32
    %c0_i32_0 = arith.constant 0 : i32
    %c0_i32_1 = arith.constant 0 : i32
    return %c0_i32, %c0_i32_0 : i32, i32
  }
  func.func @transform_2(%arg0: i32) -> (i32, i32) {
    %c0_i32 = arith.constant 0 : i32
    %c0_i32_0 = arith.constant 0 : i32
    %c0_i32_1 = arith.constant 0 : i32
    return %c0_i32, %c0_i32_0 : i32, i32
  }
  func.func @transform_3(%arg0: i32) -> (i32, i32, i32) {
    %c0_i32 = arith.constant 0 : i32
    %c0_i32_0 = arith.constant 0 : i32
    %c0_i32_1 = arith.constant 0 : i32
    %c0_i32_2 = arith.constant 0 : i32
    return %c0_i32, %c0_i32_0, %c0_i32_1 : i32, i32, i32
  }
  func.func @transform_4(%arg0: i32) -> (i32, i32, i32) {
    %c0_i32 = arith.constant 0 : i32
    %c0_i32_0 = arith.constant 0 : i32
    %c0_i32_1 = arith.constant 0 : i32
    %c0_i32_2 = arith.constant 0 : i32
    return %c0_i32, %c0_i32_0, %c0_i32_1 : i32, i32, i32
  }
  func.func @transform_5(%arg0: i32) -> (i32, i32) {
    %c0_i32 = arith.constant 0 : i32
    %c0_i32_0 = arith.constant 0 : i32
    %c0_i32_1 = arith.constant 0 : i32
    return %c0_i32, %c0_i32_0 : i32, i32
  }
  func.func @transform_6(%arg0: i32) -> (i32, i32) {
    %c0_i32 = arith.constant 0 : i32
    %c0_i32_0 = arith.constant 0 : i32
    %c0_i32_1 = arith.constant 0 : i32
    return %c0_i32, %c0_i32_0 : i32, i32
  }
  func.func @transform_7(%arg0: i32) -> (i32, i32, i32) {
    %c0_i32 = arith.constant 0 : i32
    %c0_i32_0 = arith.constant 0 : i32
    %c0_i32_1 = arith.constant 0 : i32
    return %arg0, %c0_i32, %c0_i32_0 : i32, i32, i32
  }
}

</mosaic_0001>

<bundles_post_ra>
// kernel: net_forward.1
= control target key start
LH: loop header
LB: loop body
LE: loop exit
PB: predicated region body
PF: predicated region fallthrough
CT: control target
= control target key end

     0   :  { %s704_s0 = inlined_call_operand.hbm [shape: f32[8,16], index: 0, kind: input, shape index: {}]   ;;  %s705_s1 = inlined_call_operand.hbm [shape: bf16[16,128], index: 1, kind: input, shape index: {}]   ;;  %s706_s2 = inlined_call_operand.vmem [shape: f32[1,128], index: 2, kind: input, shape index: {}]   ;;  %s707_s3 = inlined_call_operand.hbm [shape: bf16[2,128,128], index: 3, kind: input, shape index: {}]   ;;  %s708_s4 = inlined_call_operand.vmem [shape: f32[2,1,128], index: 4, kind: input, shape index: {}]   ;;  %s709_s5 = inlined_call_operand.vmem [shape: f32[1,128], index: 5, kind: input, shape index: {}]   ;;  %s710_s6 = inlined_call_operand.<no memory space> [shape: f32[1,1], index: 6, kind: input, shape index: {}]   ;;  %s711_s7 = inlined_call_operand.hbm [shape: f32[1,1,8], index: 7, kind: output, shape index: {}]  }
   0x1   :  { %v12_v0 = vstv %s710_s6 }
   0x2   :  { %13 = vst [vmem:[#allocation2] sm:$0x1] %v12_v0 }
   0x3   :  { %14 = vsyncpa [#allocation4], 0 }
   0x4   :  { %15 = vsyncpa [#allocation7], 0 }
   0x5   :  { %16 = vsyncpa [#allocation5], 0  ;;  %s608_s26 = smov [#allocation6]  }
   0x6   :  { %s32_s27 = sshll.u32 %s608_s26, 4  ;;  %s33_s27 = int_to_ptr.vmem [resolvable:$true] %s32_s27 }
   0x7   :  { %s530_s28 = scalar_lea.vmem %s33_s27, 128  ;;  %p535_p1 = scmp.lt.s32.totalorder %s33_s27, %s33_s27 }
   0x8   :  { %p531_p0 = scmp.ne.s32.totalorder %s33_s27, %s530_s28  ;;  %p536_p2 = scmp.lt.s32.totalorder %s530_s28, %s530_s28 }
   0xa   :  { %p537_p3 = por %p536_p2, %p535_p1 }
   0xc   :  { %p538_p4 = pnand %p537_p3, %p531_p0 }
   0xe   :  { %541 = shalt.err (!%p538_p4)
}
   0xf   :  { %s609_s29 = smov 64   ;;  %s610_s30 = smov 4  }
  0x10   :  { %38 = dma.hbm_to_vmem [thread:$0]  %s705_s1, 128, %s33_s27, [#allocation7], %s609_s29, %s609_s29, %s610_s30  }
  0x11   :  { %s611_s6 = smov [#allocation3]   ;;  %s612_s11 = smov [#allocation8]  }
  0x12   :  { %s23_s10 = sshll.u32 %s611_s6, 4  ;;  %s46_s12 = sshll.u32 %s612_s11, 4  ;;  %s24_s10 = int_to_ptr.vmem [resolvable:$true] %s23_s10  ;;  %s47_s12 = int_to_ptr.vmem [resolvable:$true] %s46_s12 }
  0x13   :  { %s550_s13 = scalar_lea.vmem %s24_s10, 128  ;;  %p555_p6 = scmp.lt.s32.totalorder %s24_s10, %s24_s10 }
  0x14   :  { %p551_p5 = scmp.ne.s32.totalorder %s24_s10, %s550_s13  ;;  %p556_p7 = scmp.lt.s32.totalorder %s550_s13, %s550_s13 }
  0x16   :  { %p557_p8 = por %p556_p7, %p555_p6 }
  0x18   :  { %p558_p9 = pnand %p557_p8, %p551_p5 }
  0x1a   :  { %561 = shalt.err (!%p558_p9)
}
  0x1b   :  { %26 = dma.hbm_to_vmem [thread:$0]  %s704_s0, 128, %s24_s10, [#allocation4]  }
  0x1c   :  { %s570_s16 = scalar_lea.vmem %s47_s12, 2048  ;;  %p575_p11 = scmp.lt.s32.totalorder %s47_s12, %s47_s12 }
  0x1d   :  { %p571_p10 = scmp.ne.s32.totalorder %s47_s12, %s570_s16  ;;  %p576_p12 = scmp.lt.s32.totalorder %s570_s16, %s570_s16 }
  0x1f   :  { %p577_p13 = por %p576_p12, %p575_p11 }
  0x21   :  { %p578_p0 = pnand %p577_p13, %p571_p10 }
  0x23   :  { %581 = shalt.err (!%p578_p0)
}
  0x24   :  { %52 = dma.hbm_to_vmem [thread:$0]  %s707_s3, 2048, %s47_s12, [#allocation7], %s609_s29, %s609_s29, %s610_s30  }
  0x25   :  { %602 = dma.done.wait [#allocation4], 128  }
  0x26   :  { %603 = vsyncadd [#allocation4], 4294967168 }
  0x27   :  { %604 = dma.done.wait [#allocation7], 2176  }
  0x28   :  { %605 = vsyncadd [#allocation7], 4294965120  ;;  %v613_v1 = vmov 0.0   ;;  %vm614_vm0 = vmmov 0   ;;  %v505_v2 = vld [vmem:[#allocation6] sm:$0xff]   ;;  %v69_v3 = vld [vmem:[#allocation3] sm:$0xff]  ;;  %v375_v48 = vlaneseq }
  0x29   :  { %449 = vmatprep.subr.bf16.mxu0 %v613_v1  ;;  %451 = vmatprep.mubr.msk.bf16.mxu0 %vm614_vm0, %v613_v1  ;;  %v70_v4 = vpack.c.bf16 %v69_v3, %v69_v3  ;;  %vm86_vm1 = vcmask 130048   ;;  %v506_v5 = vld [vmem:[#allocation8 + $0x38] sm:$0xff]   ;;  %v507_v6 = vld [vmem:[#allocation8 + $0x30] sm:$0xff]   ;;  %v508_v7 = vld [vmem:[#allocation8 + $0x28] sm:$0xff]   ;;  %v615_v37 = vmov 0   ;;  %vm388_vm2 = vcmask 57344  }
  0x2a   :  { %455 = vmatprep.subr.bf16.mxu1 %v613_v1  ;;  %471 = vmatprep.mubr.msk.bf16.mxu1 %vm614_vm0, %v613_v1  ;;  %v509_v8 = vld [vmem:[#allocation8 + $0x20] sm:$0xff]   ;;  %v510_v9 = vld [vmem:[#allocation8 + $0x18] sm:$0xff]   ;;  %v511_v10 = vld [vmem:[#allocation8 + $0x10] sm:$0xff]   ;;  %v376_v49 = vshrl.u32 %v375_v48, 7  ;;  %v382_v52 = vand.u32 127, %v375_v48 }
  0x2b   :  { %450 = vmatpush3.bf16.msra.mxu0 %v505_v2  ;;  %456 = vmatpush3.bf16.msra.mxu1 %v506_v5  ;;  %v512_v11 = vld [vmem:[#allocation8 + $0x8] sm:$0xff]   ;;  %v513_v12 = vld [vmem:[#allocation8] sm:$0xff]   ;;  %v514_v13 = vld [vmem:[#allocation8 + $0x78] sm:$0xff]  }
  0x2c   :  { %475 = vmatprep.subr.bf16.mxu0 %v613_v1  ;;  %457 = vmatprep.subr.bf16.mxu1 %v613_v1  ;;  %v515_v14 = vld [vmem:[#allocation8 + $0x70] sm:$0xff]   ;;  %v516_v15 = vld [vmem:[#allocation8 + $0x68] sm:$0xff]   ;;  %v517_v16 = vld [vmem:[#allocation8 + $0x60] sm:$0xff]   ;;  %v377_v51 = vsub.s32 0, %v376_v49  ;;  %v385_v54 = vsub.s32 %v382_v52, %v376_v49 }
  0x2d   :  { %v518_v17 = vld [vmem:[#allocation8 + $0x58] sm:$0xff]   ;;  %v519_v18 = vld [vmem:[#allocation8 + $0x50] sm:$0xff]   ;;  %v406_v19 = vld [vmem:[%s706_s2] ss:$0 sm:$0xff]  ;;  %504 = vset.pattern.permute.xlu0 %v615_v37 }
  0x2e   :  { %452 = vmatmul.mubr.msk.bf16.vlgmr.msra.gmra.mxu0 %vm86_vm1, %v70_v4  ;;  %v520_v27 = vld [vmem:[#allocation8 + $0x48] sm:$0xff]   ;;  %v521_v28 = vld [vmem:[#allocation8 + $0x40] sm:$0xff]   ;;  %v419_v38 = vld [vmem:[%s708_s4 + $0x1] ss:$0 sm:$0xff] }
  0x2f   :  { %491 = vmatprep.mubr.msk.bf16.mxu0 %vm614_vm0, %v613_v1  ;;  %458 = vmatpush3.bf16.msra.mxu1 %v507_v6  ;;  %v409_v29 = vld [vmem:[%s708_s4] ss:$0 sm:$0xff]  ;;  %s616_s4 = smov [#allocation9]  }
  0x30   :  { %459 = vmatprep.subr.bf16.mxu1 %v613_v1  ;;  %476 = vmatpush3.bf16.msra.mxu0 %v514_v13  ;;  %v428_v42 = vld [vmem:[%s709_s5] ss:$0 sm:$0xff]  ;;  %s396_s23 = sshll.u32 %s616_s4, 4  ;;  %s397_s23 = int_to_ptr.vmem [resolvable:$true] %s396_s23 }
  0x31   :  { %477 = vmatprep.subr.bf16.mxu0 %v613_v1  ;;  %v369_v47 = vld [vmem:[#allocation2] sm:$0x1]  ;;  %s582_s5 = scalar_lea.vmem %s397_s23, 16  ;;  %s586_s24 = scalar_lea.vmem %s397_s23, 32 }
  0x32   :  { %p583_p1 = scmp.ne.s32.totalorder %s397_s23, %s582_s5  ;;  %p587_p2 = scmp.lt.s32.totalorder %s397_s23, %s397_s23 }
  0x33   :  { %460 = vmatpush3.bf16.msra.mxu1 %v508_v7  ;;  %p588_p3 = scmp.lt.s32.totalorder %s586_s24, %s582_s5 }
  0x34   :  { %461 = vmatprep.subr.bf16.mxu1 %v613_v1  ;;  %478 = vmatpush3.bf16.msra.mxu0 %v515_v14 }
  0x35   :  { %479 = vmatprep.subr.bf16.mxu0 %v613_v1  ;;  %p589_p4 = por %p588_p3, %p587_p2 }
  0x37   :  { %462 = vmatpush3.bf16.msra.mxu1 %v509_v8  ;;  %p590_p5 = pnand %p589_p4, %p583_p1 }
  0x38   :  { %463 = vmatprep.subr.bf16.mxu1 %v613_v1  ;;  %480 = vmatpush3.bf16.msra.mxu0 %v516_v15 }
  0x39   :  { %481 = vmatprep.subr.bf16.mxu0 %v613_v1 }
  0x3b   :  { %464 = vmatpush3.bf16.msra.mxu1 %v510_v9 }
  0x3c   :  { %465 = vmatprep.subr.bf16.mxu1 %v613_v1  ;;  %482 = vmatpush3.bf16.msra.mxu0 %v517_v16 }
  0x3d   :  { %483 = vmatprep.subr.bf16.mxu0 %v613_v1 }
  0x3f   :  { %466 = vmatpush3.bf16.msra.mxu1 %v511_v10 }
  0x40   :  { %467 = vmatprep.subr.bf16.mxu1 %v613_v1  ;;  %484 = vmatpush3.bf16.msra.mxu0 %v518_v17 }
  0x41   :  { %485 = vmatprep.subr.bf16.mxu0 %v613_v1 }
  0x43   :  { %468 = vmatpush3.bf16.msra.mxu1 %v512_v11 }
  0x44   :  { %469 = vmatprep.subr.bf16.mxu1 %v613_v1  ;;  %486 = vmatpush3.bf16.msra.mxu0 %v519_v18 }
  0x45   :  { %487 = vmatprep.subr.bf16.mxu0 %v613_v1 }
  0x47   :  { %470 = vmatpush3.bf16.msra.mxu1 %v513_v12 }
  0x48   :  { %488 = vmatpush3.bf16.msra.mxu0 %v520_v27 }
  0x49   :  { %489 = vmatprep.subr.bf16.mxu0 %v613_v1 }
  0x4c   :  { %490 = vmatpush3.bf16.msra.mxu0 %v521_v28 }
  0xee   :  { %v124_v20 = vpop.f32.mrf.mxu0 }
  0xef   :  { %v125_v21 = vadd.f32 %v406_v19, %v124_v20 }
  0xf0   :  { %v453_v22 = vpop.f32.mrf.mxu0 }
  0xf1   :  { %v130_v23 = vmax.f32 %v125_v21, 0.0 }
  0xf2   :  { %v127_v24 = vpop.f32.mrf.mxu0 }
  0xf3   :  { %v131_v25 = vpack.c.bf16 %v130_v23, %v130_v23 }
  0xf4   :  { %v454_v26 = vpop.f32.mrf.mxu0 }
  0xf5   :  { %472 = vmatmul.mubr.bf16.vlgmr.msra.gmra.mxu1 %v131_v25 }
 0x1b5   :  { %v237_v30 = vpop.f32.mrf.mxu1 }
 0x1b6   :  { %v238_v31 = vadd.f32 %v409_v29, %v237_v30 }
 0x1b7   :  { %v473_v32 = vpop.f32.mrf.mxu1 }
 0x1b8   :  { %v243_v33 = vmax.f32 %v238_v31, 0.0 }
 0x1b9   :  { %v240_v34 = vpop.f32.mrf.mxu1 }
 0x1ba   :  { %v244_v35 = vpack.c.bf16 %v243_v33, %v243_v33 }
 0x1bb   :  { %v474_v36 = vpop.f32.mrf.mxu1 }
 0x1bc   :  { %492 = vmatmul.mubr.bf16.vlgmr.msra.gmra.mxu0 %v244_v35 }
 0x27c   :  { %v352_v39 = vpop.f32.mrf.mxu0 }
 0x27d   :  { %v353_v40 = vadd.f32 %v419_v38, %v352_v39 }
 0x27e   :  { %v493_v41 = vpop.f32.mrf.mxu0 }
 0x27f   :  { %v358_v43 = vmax.f32 %v353_v40, 0.0 }
 0x280   :  { %v355_v44 = vpop.f32.mrf.mxu0 }
 0x281   :  { %v366_v45 = vmul.f32 %v428_v42, %v358_v43 }
 0x282   :  { %v494_v46 = vpop.f32.mrf.mxu0 }
 0x283   :  { %367 = vadd.xlane.f32.xlu0 %v366_v45 }
 0x299   :  { %372 = vperm.xlu0 %504, %v369_v47  }
 0x30c   :  { %v368_v50 = vpop.xlane.xlu0 %367 }
 0x314   :  { %v373_v53 = vpop.permute.xlu0 %372 }
 0x315   :  { %v378_v55 = vrot.slane %v373_v53, %v377_v51 }
 0x317   :  { %v379_v56 = vadd.f32 %v378_v55, %v368_v50 }
 0x319   :  { %v386_v57 = vrot.slane %v379_v56, %v385_v54 }
 0x31b   :  { %389 = vst.msk [vmem:[#allocation9] sm:$0x1] %vm388_vm2, %v386_v57 }
 0x31c   :  { %593 = shalt.err (!%p590_p5)
}
 0x31d   :  { %399 = dma.vmem_to_hbm [thread:$0]  %s397_s23, 16, %s711_s7, [#allocation5]  }
 0x31e   :  { %606 = dma.done.wait [#allocation5], 16  }
 0x31f   :  { %607 = vsyncadd [#allocation5], 4294967280 }
 0x320   :  { %403 = vsyncpa [#allocation4], 1 }
 0x321   :  { %404 = vsyncpa [#allocation7], 1 }
 0x322   :  { %405 = vsyncpa [#allocation5], 1 }

</bundles_post_ra>
